<compile_context>
chip_gen: v6e
topology: v6e:2x2x1
jax: 0.10.0
libtpu: 0.0.40
codegen_flags: <defaults>
</compile_context>

<pallas_src>
import math

import jax
import jax.numpy as jnp
from jax.experimental import pallas as pl
from jax.experimental.pallas import tpu as pltpu


_VMEM_LIMIT = 48 * 1024 * 1024  # stays under v7x's 64 MiB physical VMEM


# ---------------------------------------------------------------------------
# Kernels
# ---------------------------------------------------------------------------
def _support_kernel(x_ref, w_ref, s_ref, acc_ref):
    """Stage 1: support = X @ W  (bf16 inputs, f32 MXU acc, bf16 output).

    x_ref : (tm, tki) bf16   w_ref : (tki, tn) bf16
    s_ref : (tm, tn)  bf16   acc_ref: (tm, tn) f32 scratch
    """
    k = pl.program_id(2)

    @pl.when(k == 0)
    def _():
        acc_ref[...] = jnp.zeros_like(acc_ref)

    acc_ref[...] += jnp.dot(x_ref[...], w_ref[...],
                            preferred_element_type=jnp.float32)

    @pl.when(k == pl.num_programs(2) - 1)
    def _():
        s_ref[...] = acc_ref[...].astype(s_ref.dtype)


def _agg_kernel_f32(adj_ref, s_ref, b_ref, out_ref):
    """Stage 2 (f32 output): out = adj @ support (+ bias).

    Accumulates directly into the resident f32 output block (no scratch).
    adj_ref: (tm, tk) bf16   s_ref: (tk, tn) bf16
    b_ref  : (1, tn)  f32    out_ref: (tm, tn) f32
    """
    k = pl.program_id(2)

    @pl.when(k == 0)
    def _():
        out_ref[...] = jnp.zeros_like(out_ref)

    out_ref[...] += jnp.dot(adj_ref[...], s_ref[...],
                            preferred_element_type=jnp.float32)

    @pl.when(k == pl.num_programs(2) - 1)
    def _():
        out_ref[...] += b_ref[...]


def _agg_kernel_cast(adj_ref, s_ref, b_ref, out_ref, acc_ref):
    """Stage 2 (narrow output): f32 scratch accumulator, cast in epilogue."""
    k = pl.program_id(2)

    @pl.when(k == 0)
    def _():
        acc_ref[...] = jnp.zeros_like(acc_ref)

    acc_ref[...] += jnp.dot(adj_ref[...], s_ref[...],
                            preferred_element_type=jnp.float32)

    @pl.when(k == pl.num_programs(2) - 1)
    def _():
        out_ref[...] = (acc_ref[...] + b_ref[...]).astype(out_ref.dtype)


# ---------------------------------------------------------------------------
# Wrapper
# ---------------------------------------------------------------------------
def _round_up(x, m):
    return (x + m - 1) // m * m


def _pick_tile(dim_pad, preferred):
    """Largest multiple-of-128 divisor of dim_pad that is <= preferred."""
    t = min(preferred, dim_pad)
    t = max(128, (t // 128) * 128)
    while dim_pad % t != 0:
        t -= 128
    return t


def _pad_cast(a, shape, dtype):
    """Cast + zero-pad; skipped entirely when already matching (no extra copy)."""
    if a.shape == shape and a.dtype == dtype:
        return a
    a = a.astype(dtype)
    if a.shape != shape:
        a = jnp.zeros(shape, dtype).at[:a.shape[0], :a.shape[1]].set(a)
    return a


def graph_convolution(x, weight, adj, bias=None):
    """Pallas GCN layer: adj @ (x @ weight) [+ bias]."""
    n, f_in = x.shape
    f_in_w, f_out = weight.shape
    assert f_in == f_in_w
    assert adj.shape == (n, n)

    out_dtype = x.dtype

    # Pad to MXU/lane-friendly multiples of 128 (zero padding preserves math).
    n_pad = _round_up(n, 128)
    f_in_pad = _round_up(f_in, 128)
    f_out_pad = _round_up(f_out, 128)

    # Tile selection: prefer 256-512, always dividing the padded dims.
    # Cap tm so the "parallel" row axis has >= 2 tiles (feeds both v7x TCs).
    tm = _pick_tile(n_pad, min(512, max(128, n_pad // 2)))
    tk = _pick_tile(n_pad, 512)        # reduction over adjacency columns
    tn = _pick_tile(f_out_pad, 512)    # output-feature tile
    tki = _pick_tile(f_in_pad, 512)    # reduction over input features

    # bf16 inputs for native MXU rate + halved HBM traffic; f32 accumulation.
    x_p = _pad_cast(x, (n_pad, f_in_pad), jnp.bfloat16)
    w_p = _pad_cast(weight, (f_in_pad, f_out_pad), jnp.bfloat16)
    adj_p = _pad_cast(adj, (n_pad, n_pad), jnp.bfloat16)
    b_p = jnp.zeros((1, f_out_pad), jnp.float32)
    if bias is not None:
        b_p = b_p.at[0, :f_out].set(bias.astype(jnp.float32))

    # --- Stage 1: support = X @ W (computed once, streamed to stage 2) ------
    support_grid = (n_pad // tm, f_out_pad // tn, f_in_pad // tki)
    support_bytes = (n_pad * f_in_pad * 2 * (f_out_pad // tn)
                     + f_in_pad * f_out_pad * 2 * (n_pad // tm)
                     + n_pad * f_out_pad * 2)
    support = pl.pallas_call(
        _support_kernel,
        out_shape=jax.ShapeDtypeStruct((n_pad, f_out_pad), jnp.bfloat16),
        grid_spec=pltpu.PrefetchScalarGridSpec(
            num_scalar_prefetch=0,
            grid=support_grid,
            in_specs=[
                pl.BlockSpec((tm, tki), lambda i, j, k: (i, k)),   # X tile
                pl.BlockSpec((tki, tn), lambda i, j, k: (k, j)),   # W tile
            ],
            out_specs=pl.BlockSpec((tm, tn), lambda i, j, k: (i, j)),
            scratch_shapes=[pltpu.VMEM((tm, tn), jnp.float32)],
        ),
        compiler_params=pltpu.CompilerParams(
            dimension_semantics=("parallel", "parallel", "arbitrary"),
            vmem_limit_bytes=_VMEM_LIMIT,
        ),
        cost_estimate=pl.CostEstimate(
            flops=2 * n_pad * f_in_pad * f_out_pad,
            transcendentals=0,
            bytes_accessed=support_bytes),
    )(x_p, w_p)

    # --- Stage 2: out = adj @ support (+ bias) -------------------------------
    agg_grid = (n_pad // tm, f_out_pad // tn, n_pad // tk)
    agg_bytes = (n_pad * n_pad * 2 * (f_out_pad // tn)
                 + n_pad * f_out_pad * 2 * (n_pad // tm)
                 + n_pad * f_out_pad * jnp.dtype(out_dtype).itemsize)
    agg_in_specs = [
        pl.BlockSpec((tm, tk), lambda i, j, k: (i, k)),   # adj tile
        pl.BlockSpec((tk, tn), lambda i, j, k: (k, j)),   # support tile
        pl.BlockSpec((1, tn), lambda i, j, k: (0, j)),    # bias (column-blocked)
    ]
    agg_out_spec = pl.BlockSpec((tm, tn), lambda i, j, k: (i, j))
    agg_common = dict(
        out_shape=jax.ShapeDtypeStruct((n_pad, f_out_pad), out_dtype),
        compiler_params=pltpu.CompilerParams(
            dimension_semantics=("parallel", "parallel", "arbitrary"),
            vmem_limit_bytes=_VMEM_LIMIT,
        ),
        cost_estimate=pl.CostEstimate(
            flops=2 * n_pad * n_pad * f_out_pad,
            transcendentals=0,
            bytes_accessed=agg_bytes),
    )

    if out_dtype == jnp.float32:
        # Accumulate directly into the resident f32 output block (no scratch).
        out_padded = pl.pallas_call(
            _agg_kernel_f32,
            grid_spec=pltpu.PrefetchScalarGridSpec(
                num_scalar_prefetch=0,
                grid=agg_grid,
                in_specs=agg_in_specs,
                out_specs=agg_out_spec,
            ),
            **agg_common,
        )(adj_p, support, b_p)
    else:
        out_padded = pl.pallas_call(
            _agg_kernel_cast,
            grid_spec=pltpu.PrefetchScalarGridSpec(
                num_scalar_prefetch=0,
                grid=agg_grid,
                in_specs=agg_in_specs,
                out_specs=agg_out_spec,
                scratch_shapes=[pltpu.VMEM((tm, tn), jnp.float32)],
            ),
            **agg_common,
        )(adj_p, support, b_p)

    return out_padded[:n, :f_out]


def init_gcn_params(key, in_features, out_features, bias=False):
    """Deterministic init matching GraphConvolution.reset_parameters()."""
    stdv = 1.0 / math.sqrt(out_features)
    k_w, k_b = jax.random.split(key)
    weight = jax.random.uniform(
        k_w, (in_features, out_features), dtype=jnp.float32, minval=-stdv, maxval=stdv
    )
    if bias:
        b = jax.random.uniform(
            k_b, (out_features,), dtype=jnp.float32, minval=-stdv, maxval=stdv
        )
        return weight, b
    return weight, None


if __name__ == "__main__":
    key = jax.random.PRNGKey(0)
    k_x, k_adj, k_param = jax.random.split(key, 3)

    # Small GCN problem: N nodes, in_features -> out_features
    N, F_IN, F_OUT = 256, 64, 32

    x = jax.random.normal(k_x, (N, F_IN), dtype=jnp.float32)

    # Build a symmetric-ish normalized adjacency (dense), deterministic.
    raw = jax.random.uniform(k_adj, (N, N), dtype=jnp.float32)
    adj = (raw > 0.9).astype(jnp.float32)
    adj = adj + adj.T + jnp.eye(N, dtype=jnp.float32)
    deg = jnp.sum(adj, axis=1, keepdims=True)
    adj = adj / deg  # row-normalized adjacency

    weight, _ = init_gcn_params(k_param, F_IN, F_OUT, bias=False)

    out = graph_convolution(x, weight, adj)
    out = jax.block_until_ready(out)
    assert out.shape == (N, F_OUT)

    # Reference 1: same bf16-input / f32-accumulation recipe (tight tolerance).
    x_bf = x.astype(jnp.bfloat16)
    w_bf = weight.astype(jnp.bfloat16)
    adj_bf = adj.astype(jnp.bfloat16)
    support_bf = jnp.dot(x_bf, w_bf, preferred_element_type=jnp.float32)
    ref_bf16 = jnp.dot(adj_bf, support_bf.astype(jnp.bfloat16),
                       preferred_element_type=jnp.float32)
    assert jnp.allclose(out, ref_bf16, atol=1e-3, rtol=1e-3)

    # Reference 2: full f32 math (relaxed tolerance due to bf16 inputs).
    ref_f32 = adj @ (x @ weight)
    assert jnp.allclose(out, ref_f32, atol=5e-2, rtol=5e-2)

    # Also exercise the bias path once.
    weight_b, bias_b = init_gcn_params(k_param, F_IN, F_OUT, bias=True)
    out_b = jax.block_until_ready(graph_convolution(x, weight_b, adj, bias=bias_b))
    ref_b = adj @ (x @ weight_b) + bias_b
    assert jnp.allclose(out_b, ref_b, atol=5e-2, rtol=5e-2)

    print("KERNEL_OK")
</pallas_src>

<mosaic_0001>
module attributes {stable_mosaic.version = 11 : i64} {
  func.func @_support_kernel(%arg0: i32, %arg1: i32, %arg2: i32, %arg3: memref<128x128xbf16, #tpu.memory_space<vmem>>, %arg4: memref<128x128xbf16, #tpu.memory_space<vmem>>, %arg5: memref<128x128xbf16, #tpu.memory_space<vmem>>, %arg6: memref<128x128xf32, #tpu.memory_space<vmem>>) attributes {dimension_semantics = [#tpu.dimension_semantics<parallel>, #tpu.dimension_semantics<parallel>, #tpu.dimension_semantics<arbitrary>], iteration_bounds = array<i64: 2, 1, 1>, scalar_prefetch = 0 : i64, scratch_operands = 1 : i64, tpu.core_type = #tpu.core_type<tc>, window_params = [{transform_indices = @transform_0, window_bounds = array<i64: 128, 128>}, {transform_indices = @transform_1, window_bounds = array<i64: 128, 128>}, {transform_indices = @transform_2, window_bounds = array<i64: 128, 128>}]} {
    %c0_i32 = arith.constant 0 : i32
    %0 = arith.cmpi eq, %arg2, %c0_i32 : i32
    %1 = arith.extui %0 : i1 to i32
    %c0_i32_0 = arith.constant 0 : i32
    %2 = arith.cmpi ne, %1, %c0_i32_0 : i32
    scf.if %2 {
      %cst_10 = arith.constant 0.000000e+00 : f32
      %12 = vector.broadcast %cst_10 : f32 to vector<128x128xf32>
      %c0_11 = arith.constant 0 : index
      %c0_12 = arith.constant 0 : index
      %13 = vector.load %arg6[%c0_11, %c0_12] : memref<128x128xf32, #tpu.memory_space<vmem>>, vector<128x128xf32>
      tpu.vector_store %arg6[%c0_11, %c0_12], %12 {strides = array<i32>} : memref<128x128xf32, #tpu.memory_space<vmem>>, vector<128x128xf32>,
    } else {
    }
    %c0 = arith.constant 0 : index
    %c0_1 = arith.constant 0 : index
    %3 = vector.load %arg6[%c0, %c0_1] : memref<128x128xf32, #tpu.memory_space<vmem>>, vector<128x128xf32>
    %c0_2 = arith.constant 0 : index
    %c0_3 = arith.constant 0 : index
    %4 = vector.load %arg3[%c0_2, %c0_3] : memref<128x128xbf16, #tpu.memory_space<vmem>>, vector<128x128xbf16>
    %c0_4 = arith.constant 0 : index
    %c0_5 = arith.constant 0 : index
    %5 = vector.load %arg4[%c0_4, %c0_5] : memref<128x128xbf16, #tpu.memory_space<vmem>>, vector<128x128xbf16>
    %cst = arith.constant dense<0.000000e+00> : vector<128x128xf32>
    %6 = tpu.matmul %4, %5, %cst {dimension_numbers = #tpu.dot_dimension_numbers<[1], [0], [0], [1], [0, 0, 1, 1], [], []>} : vector<128x128xbf16>, vector<128x128xbf16>, vector<128x128xf32> -> vector<128x128xf32>
    %7 = arith.addf %3, %6 : vector<128x128xf32>
    %c0_6 = arith.constant 0 : index
    %c0_7 = arith.constant 0 : index
    %8 = vector.load %arg6[%c0_6, %c0_7] : memref<128x128xf32, #tpu.memory_space<vmem>>, vector<128x128xf32>
    tpu.vector_store %arg6[%c0_6, %c0_7], %7 {strides = array<i32>} : memref<128x128xf32, #tpu.memory_space<vmem>>, vector<128x128xf32>,
    %c0_i32_8 = arith.constant 0 : i32
    %9 = arith.cmpi eq, %arg2, %c0_i32_8 : i32
    %10 = arith.extui %9 : i1 to i32
    %c0_i32_9 = arith.constant 0 : i32
    %11 = arith.cmpi ne, %10, %c0_i32_9 : i32
    scf.if %11 {
      %c0_10 = arith.constant 0 : index
      %c0_11 = arith.constant 0 : index
      %12 = vector.load %arg6[%c0_10, %c0_11] : memref<128x128xf32, #tpu.memory_space<vmem>>, vector<128x128xf32>
      %13 = arith.truncf %12 : vector<128x128xf32> to vector<128x128xbf16>
      %c0_12 = arith.constant 0 : index
      %c0_13 = arith.constant 0 : index
      %14 = vector.load %arg5[%c0_12, %c0_13] : memref<128x128xbf16, #tpu.memory_space<vmem>>, vector<128x128xbf16>
      tpu.vector_store %arg5[%c0_12, %c0_13], %13 {strides = array<i32>} : memref<128x128xbf16, #tpu.memory_space<vmem>>, vector<128x128xbf16>,
    } else {
    }
    return
  }
  func.func @transform_0(%arg0: i32, %arg1: i32, %arg2: i32) -> (i32, i32) {
    %c0_i32 = arith.constant 0 : i32
    return %arg0, %arg2 : i32, i32
  }
  func.func @transform_1(%arg0: i32, %arg1: i32, %arg2: i32) -> (i32, i32) {
    %c0_i32 = arith.constant 0 : i32
    return %arg2, %arg1 : i32, i32
  }
  func.func @transform_2(%arg0: i32, %arg1: i32, %arg2: i32) -> (i32, i32) {
    %c0_i32 = arith.constant 0 : i32
    return %arg0, %arg1 : i32, i32
  }
}

</mosaic_0001>

<bundles_post_ra>
// kernel: tpu_custom_call.1
= control target key start
LH: loop header
LB: loop body
LE: loop exit
PB: predicated region body
PF: predicated region fallthrough
CT: control target
= control target key end

     0   :  { %7 = vsyncpa [#allocation4], 0  ;;  %s1359_s0 = inlined_call_operand.hbm [shape: bf16[256,128], index: 0, kind: input, shape index: {}]   ;;  %s1360_s1 = inlined_call_operand.hbm [shape: bf16[128,128], index: 1, kind: input, shape index: {}]   ;;  %s1361_s2 = inlined_call_operand.hbm [shape: bf16[256,128], index: 2, kind: output, shape index: {}]  }
   0x1   :  { %9 = vsyncpa [#allocation4 + $0x1], 0 }
   0x2   :  { %10 = vsyncpa [#allocation7], 0 }
   0x3   :  { %11 = vsyncpa [#allocation5], 0 }
   0x4   :  { %13 = vsyncpa [#allocation5 + $0x1], 0  ;;  %s1158_s9 = smov 0   ;;  %s1160_s10 = smov 0  }
   0x5   :  { %s1162_s11 = smov 0   ;;  %s1164_s12 = smov 0  }
   0x6   :  { %s1166_s13 = smov 0   ;;  %s1168_s14 = smov 0  }
   0x7 LB: > { %s725_s15 = sadd.s32 4294967295, %s1134_s14   ;;  %s726_s16 = sadd.s32 4294967294, %s1134_s14   ;;  %s1134_s14 = sphi %s1168_s14, %s19_s14   ;;  %s1130_s13 = sphi %s1166_s13, %s1381_s13   ;;  %s1126_s12 = sphi %s1164_s12, %s1380_s12   ;;  %s1122_s11 = sphi %s1162_s11, %s1379_s11   ;;  %s1118_s10 = sphi %s1160_s10, %s1378_s10   ;;  %s1114_s9 = sphi %s1158_s9, %s1377_s9  }
   0x8   : > { %p60_p0 = scmp.ne.s32.totalorder %s1118_s10, %s1114_s9  ;;  %p1192_p1 = scmp.eq.s32.totalorder %s725_s15, 0 }
   0x9   : > { %p1196_p2 = scmp.eq.s32.totalorder %s725_s15, 1  ;;  %p120_p3 = scmp.eq.s32.totalorder %s726_s16, 1 }
   0xa   : > { %p1202_p4 = por %p1192_p1, %p60_p0  ;;  %p727_p5 = scmp.ge.s32.totalorder %s1134_s14, 1 }
   0xb   : > { %p1207_p6 = por %p120_p3, %p60_p0  ;;  %p127_p7 = scmp.lt.s32.totalorder %s1134_s14, 3 }
   0xc   : > { %s1366_s19 = scalar_select %p1202_p4, 1, 0 }
   0xd   : > { %s1367_s20 = scalar_select %p1207_p6, 1, 0 }
   0xe   : > { %p1212_p8 = pnand %p727_p5, %p127_p7  ;;  %s1136_s22 = smov [#allocation6]  }
   0xf   : > { %s143_s23 = sshll.u32 %s1136_s22, 4  ;;  %s38_s25 = sadd.s32 1, %s1130_s13  ;;  %s144_s23 = int_to_ptr.vmem [resolvable:$true] %s143_s23 }
  0x10   : > { %p911_p9 = pneg %p1212_p8  ;;  %s1007_s26 = scalar_lea.vmem %s144_s23, 1024 }
  0x11   : > { %p1008_p13 = scmp.ne.s32.totalorder %s144_s23, %s1007_s26  ;;  %p1015_p5 = scmp.lt.s32.totalorder %s144_s23, %s144_s23 }
  0x12   : > { %p1221_p11 = pnand %p911_p9, %p1192_p1  ;;  %p1016_p7 = scmp.lt.s32.totalorder %s1007_s26, %s1007_s26 }
  0x14   : > { %p998_p12 = pneg %p1221_p11  ;;  %p1017_p6 = por %p1016_p7, %p1015_p5 }
  0x16   : > { %p1010_p0 = pnand %p1008_p13, %p998_p12 }
  0x18   : > { %p1011_p3 = pneg %p1010_p0 }
  0x1a   : > { %p1018_p4 = pnand %p1017_p6, %p1011_p3 }
  0x1c   : > { %1021 = shalt.err (!%p1018_p4)
}
  0x1d   : > { %s1363_s27 = smov 64   ;;  %s1138_s28 = smov 4  }
  0x1e   : > { %914 = dma.hbm_to_vmem [thread:$0]  (!%p1221_p11), %s1360_s1, 1024, %s144_s23, [#allocation7], %s1363_s27, %s1363_s27, %s1138_s28  }
  0x1f   : > { %p40_p4 = scmp.ge.s32.totalorder %s38_s25, 2  ;;  %s47_s3 = sadd.s32 1, %s1122_s11 }
  0x20   : > { %p54_p6 = scmp.ne.s32.totalorder %s1122_s11, %s1118_s10  ;;  %p55_p9 = scmp.eq.s32.totalorder %s1134_s14, 0 }
  0x21   : > { %s1383_s25 = smov (%p40_p4, %s38_s25), 0  ;;  %p924_p0 = scmp.lt.s32.totalorder %s1134_s14, 2 }
  0x22   : > { %p1242_p12 = por %p55_p9, %p54_p6  ;;  %p1248_p13 = por %p1196_p2, %p54_p6 }
  0x23   : > { %s42_s6 = ssub.s32 %s1130_s13, %s1383_s25  ;;  %s157_s7 = sand.u32 1, %s1122_s11  }
  0x24   : > { %p45_p11 = scmp.eq.s32.totalorder %s42_s6, 0  ;;  %s730_s8 = sshll.u32 %s157_s7, 6 }
  0x25   : > { %s774_s16 = sshll.u32 %s1130_s13, 10  ;;  %s161_s26 = scalar_lea.vmem [#allocation3], %s730_s8 }
  0x26   : > { %s1257_s15 = scalar_select %p45_p11, %s1122_s11, %s47_s3  }
  0x27   : > { %s168_s24 = scalar_lea.hbm %s1359_s0, %s774_s16  ;;  %s169_s29 = sshll.u32 %s161_s26, 4  ;;  %s170_s29 = int_to_ptr.vmem [resolvable:$true] %s169_s29 }
  0x28   : > { %p1265_p2 = pnand %p924_p0, %p1242_p12  ;;  %s158_s30 = scalar_lea.sflag [#allocation4], %s157_s7 }
  0x29   : > { %s1035_s6 = scalar_lea.vmem %s170_s29, 1024  ;;  %s1139_s3 = smov [#allocation3]  }
  0x2a   : > { %p1024_p3 = pneg %p1265_p2  ;;  %p1036_p5 = scmp.ne.s32.totalorder %s170_s29, %s1035_s6 }
  0x2b   : > { %s1040_s27 = sshll.u32 %s1139_s3, 4  ;;  %s1041_s27 = int_to_ptr.vmem [resolvable:$false] %s1040_s27 }
  0x2c   : > { %p1038_p7 = pnand %p1036_p5, %p1024_p3  ;;  %s1042_s16 = scalar_lea.vmem %s1041_s27, 2048 }
  0x2d   : > { %p1043_p6 = scmp.lt.s32.totalorder %s170_s29, %s1041_s27  ;;  %p1044_p9 = scmp.lt.s32.totalorder %s1042_s16, %s1035_s6 }
  0x2e   : > { %p1039_p4 = pneg %p1038_p7 }
  0x2f   : > { %p1045_p11 = por %p1044_p9, %p1043_p6 }
  0x31   : > { %p1046_p10 = pnand %p1045_p11, %p1039_p4 }
  0x33   : > { %1049 = shalt.err (!%p1046_p10)
}
  0x34   : > { %s1373_s4 = smov 64   ;;  %181 = sbr.rel (%p1212_p8) target bundleno = 316 (0x13c), region = 28 }
  0x35   : > { %918 = dma.hbm_to_vmem [thread:$0]  (!%p1265_p2), %s168_s24, 1024, %s170_s29, %s158_s30, %s1373_s4, %s1373_s4, %s1138_s28  }
  0x36   : > { %s1279_s7 = sand.u32 (!%p1212_p8), 1, %s1118_s10   ;;  %p1374_p10 = scmp.ne.s32.totalorder (!%p1212_p8), %s1366_s19, 0 }
  0x37   : > { %s734_s27 = sshll.u32 (!%p1212_p8), %s1279_s7, 6  ;;  %s184_s8 = scalar_lea.sflag (!%p1212_p8), [#allocation4], %s1279_s7 }
  0x38   : > { %s1285_s22 = scalar_lea.vmem (!%p1212_p8), [#allocation3], %s734_s27 }
  0x39   : > { %1101 = dma.done.wait (%p1374_p10), %s184_s8, 1024  }
  0x3a   : > { %1103 = vsyncadd (%p1374_p10), %s184_s8, 4294966272 }
  0x3b   : > { %1105 = dma.done.wait (%p1192_p1), [#allocation7], 1024  }
  0x3c   : > { %1107 = vsyncadd (%p1192_p1), [#allocation7], 4294966272  ;;  %v980_v0 = vld [vmem:[#allocation6 + $0x38] sm:$0xff]   ;;  %v981_v1 = vld [vmem:[#allocation6 + $0x30] sm:$0xff]   ;;  %s211_s17 = scalar_lea.vmem [#allocation8], %s734_s27  ;;  %s791_s21 = sshll.u32 %s1126_s12, 10 }
  0x3d   : > { %855 = vmatprep.subr.bf16.mxu0 %v980_v0  ;;  %887 = vmatprep.subr.bf16.mxu1 %v980_v0  ;;  %v982_v2 = vld [vmem:[#allocation6 + $0x28] sm:$0xff]   ;;  %v983_v3 = vld [vmem:[#allocation6 + $0x20] sm:$0xff]   ;;  %v984_v6 = vld [vmem:[#allocation6 + $0x18] sm:$0xff]   ;;  %s623_s19 = sshll.u32 %s211_s17, 4  ;;  %s1311_s24 = scalar_lea.hbm %s1361_s2, %s791_s21  ;;  %s1306_s19 = int_to_ptr.vmem [resolvable:$true] %s623_s19 }
  0x3e   : > { %856 = vmatpush3.bf16.msra.mxu0 %v980_v0  ;;  %895 = vmatpush3.bf16.msra.mxu1 %v980_v0  ;;  %v988_v4 = vld [vmem:[%s1285_s22] sm:$0xff]   ;;  %v985_v7 = vld [vmem:[#allocation6 + $0x10] sm:$0xff]   ;;  %v986_v8 = vld [vmem:[#allocation6 + $0x8] sm:$0xff]   ;;  %s609_s12 = scalar_lea.sflag [#allocation5], %s1279_s7  ;;  %s1050_s26 = scalar_lea.vmem %s1306_s19, 1024 }
  0x3f   : > { %857 = vmatprep.subr.bf16.mxu0 %v981_v1  ;;  %888 = vmatprep.subr.bf16.mxu1 %v981_v1  ;;  %v989_v5 = vld [vmem:[%s1285_s22 + $0x20] sm:$0xff]   ;;  %v990_v10 = vld [vmem:[%s1285_s22 + $0x8] sm:$0xff]   ;;  %v992_v12 = vld [vmem:[%s1285_s22 + $0x10] sm:$0xff]   ;;  %p1051_p1 = scmp.ne.s32.totalorder %s1306_s19, %s1050_s26  ;;  %s1140_s29 = smov [#allocation8]  }
  0x40   : > { %871 = vmatprep.mubr.bf16.mxu0 %v988_v4  ;;  %879 = vmatprep.mubr.bf16.mxu1 %v989_v5  ;;  %v987_v9 = vld [vmem:[#allocation6] sm:$0xff]   ;;  %v991_v11 = vld [vmem:[%s1285_s22 + $0x28] sm:$0xff]   ;;  %v993_v13 = vld [vmem:[%s1285_s22 + $0x30] sm:$0xff]   ;;  %s1054_s18 = sshll.u32 %s1140_s29, 4  ;;  %s1055_s18 = int_to_ptr.vmem [resolvable:$false] %s1054_s18 }
  0x41   : > { %v994_v14 = vld [vmem:[%s1285_s22 + $0x18] sm:$0xff]   ;;  %p1052_p8 = pnand %p1051_p1, %p1248_p13  ;;  %s1056_s30 = scalar_lea.vmem %s1055_s18, 2048 }
  0x42   : > { %858 = vmatpush3.bf16.msra.mxu0 %v981_v1  ;;  %896 = vmatpush3.bf16.msra.mxu1 %v981_v1  ;;  %v995_v15 = vld [vmem:[%s1285_s22 + $0x38] sm:$0xff]   ;;  %p1057_p0 = scmp.lt.s32.totalorder %s1306_s19, %s1055_s18  ;;  %p1058_p2 = scmp.lt.s32.totalorder %s1056_s30, %s1050_s26 }
  0x43   : > { %859 = vmatprep.subr.bf16.mxu0 %v982_v2  ;;  %889 = vmatprep.subr.bf16.mxu1 %v982_v2  ;;  %p1053_p12 = pneg %p1052_p8 }
  0x44   : > { %p1059_p3 = por %p1058_p2, %p1057_p0 }
  0x46   : > { %860 = vmatpush3.bf16.msra.mxu0 %v982_v2  ;;  %897 = vmatpush3.bf16.msra.mxu1 %v982_v2  ;;  %p1060_p5 = pnand %p1059_p3, %p1053_p12 }
  0x47   : > { %861 = vmatprep.subr.bf16.mxu0 %v983_v3  ;;  %890 = vmatprep.subr.bf16.mxu1 %v983_v3 }
  0x4a   : > { %862 = vmatpush3.bf16.msra.mxu0 %v983_v3  ;;  %898 = vmatpush3.bf16.msra.mxu1 %v983_v3 }
  0x4b   : > { %863 = vmatprep.subr.bf16.mxu0 %v984_v6  ;;  %891 = vmatprep.subr.bf16.mxu1 %v984_v6 }
  0x4e   : > { %864 = vmatpush3.bf16.msra.mxu0 %v984_v6  ;;  %899 = vmatpush3.bf16.msra.mxu1 %v984_v6 }
  0x4f   : > { %865 = vmatprep.subr.bf16.mxu0 %v985_v7  ;;  %892 = vmatprep.subr.bf16.mxu1 %v985_v7 }
  0x52   : > { %866 = vmatpush3.bf16.msra.mxu0 %v985_v7  ;;  %900 = vmatpush3.bf16.msra.mxu1 %v985_v7 }
  0x53   : > { %867 = vmatprep.subr.bf16.mxu0 %v986_v8  ;;  %893 = vmatprep.subr.bf16.mxu1 %v986_v8 }
  0x56   : > { %868 = vmatpush3.bf16.msra.mxu0 %v986_v8  ;;  %901 = vmatpush3.bf16.msra.mxu1 %v986_v8 }
  0x57   : > { %869 = vmatprep.subr.bf16.mxu0 %v987_v9  ;;  %894 = vmatprep.subr.bf16.mxu1 %v987_v9 }
  0x5a   : > { %870 = vmatpush3.bf16.msra.mxu0 %v987_v9  ;;  %902 = vmatpush3.bf16.msra.mxu1 %v987_v9 }
  0x5d   : > { %872 = vmatmul.mubr.bf16.vlgmr.msra.gmra.mxu0 %v990_v10  ;;  %880 = vmatmul.mubr.bf16.vlgmr.msra.gmra.mxu1 %v991_v11 }
  0x5e   : > { %875 = vmatprep.mubr.bf16.mxu0 %v992_v12  ;;  %883 = vmatprep.mubr.bf16.mxu1 %v993_v13 }
  0x65   : > { %876 = vmatmul.mubr.bf16.gmra.mxu0 %v994_v14  ;;  %884 = vmatmul.mubr.bf16.gmra.mxu1 %v995_v15 }
 0x11d   : > { %v873_v16 = vpop.f32.mrf.mxu0  ;;  %v881_v17 = vpop.f32.mrf.mxu1 }
 0x11f   : > { %v414_v18 = vpop.f32.mrf.mxu0  ;;  %v446_v19 = vpop.f32.mrf.mxu1 }
 0x121   : > { %v874_v20 = vpop.f32.mrf.mxu0  ;;  %v882_v21 = vpop.f32.mrf.mxu1 }
 0x122   : > { %v800_v22 = vpack.c.bf16 %v874_v20, %v873_v16  ;;  %v820_v23 = vpack.c.bf16 %v882_v21, %v881_v17 }
 0x123   : > { %v417_v24 = vpop.f32.mrf.mxu0  ;;  %v449_v25 = vpop.f32.mrf.mxu1 }
 0x124   : > { %832 = vst [vmem:[%s211_s17 + $0x8] sm:$0xff] %v800_v22   ;;  %836 = vst [vmem:[%s211_s17 + $0x28] sm:$0xff] %v820_v23   ;;  %v795_v26 = vpack.c.bf16 %v417_v24, %v414_v18  ;;  %v815_v27 = vpack.c.bf16 %v449_v25, %v446_v19 }
 0x125   : > { %v877_v28 = vpop.f32.mrf.mxu0  ;;  %v885_v29 = vpop.f32.mrf.mxu1 }
 0x126   : > { %796 = vst [vmem:[%s211_s17] sm:$0xff] %v795_v26   ;;  %835 = vst [vmem:[%s211_s17 + $0x20] sm:$0xff] %v815_v27  }
 0x127   : > { %v430_v30 = vpop.f32.mrf.mxu0  ;;  %v462_v31 = vpop.f32.mrf.mxu1 }
 0x129   : > { %v878_v32 = vpop.f32.mrf.mxu0  ;;  %v886_v33 = vpop.f32.mrf.mxu1 }
 0x12a   : > { %v810_v34 = vpack.c.bf16 %v878_v32, %v877_v28  ;;  %v830_v35 = vpack.c.bf16 %v886_v33, %v885_v29 }
 0x12b   : > { %v433_v36 = vpop.f32.mrf.mxu0  ;;  %v465_v37 = vpop.f32.mrf.mxu1 }
 0x12c   : > { %834 = vst [vmem:[%s211_s17 + $0x18] sm:$0xff] %v810_v34   ;;  %838 = vst [vmem:[%s211_s17 + $0x38] sm:$0xff] %v830_v35   ;;  %v805_v38 = vpack.c.bf16 %v433_v36, %v430_v30  ;;  %v825_v39 = vpack.c.bf16 %v465_v37, %v462_v31 }
 0x12e   : > { %833 = vst [vmem:[%s211_s17 + $0x10] sm:$0xff] %v805_v38   ;;  %837 = vst [vmem:[%s211_s17 + $0x30] sm:$0xff] %v825_v39  }
 0x12f   : > { %1063 = shalt.err (!%p1060_p5)
}
 0x130   : > { %s1064_s6 = scalar_lea.hbm %s1311_s24, 1024  ;;  %s1068_s4 = scalar_lea.hbm %s1361_s2, 2048 }
 0x131   : > { %p1065_p7 = scmp.ne.s32.totalorder %s1311_s24, %s1064_s6  ;;  %p1069_p9 = scmp.lt.s32.totalorder %s1311_s24, %s1361_s2 }
 0x132   : > { %p1070_p11 = scmp.lt.s32.totalorder %s1068_s4, %s1064_s6 }
 0x133   : > { %p1066_p4 = pnand %p1065_p7, %p1248_p13 }
 0x134   : > { %p1071_p10 = por %p1070_p11, %p1069_p9 }
 0x135   : > { %p1067_p6 = pneg %p1066_p4 }
 0x137   : > { %p1072_p1 = pnand %p1071_p10, %p1067_p6 }
 0x139   : > { %1075 = shalt.err (!%p1072_p1)
}
 0x13a   : > { %s1141_s22 = smov 64   ;;  %s1142_s17 = smov 4  }
 0x13b   : > { %909 = dma.vmem_to_hbm [thread:$0]  (%p1248_p13), %s1306_s19, 1024, %s1311_s24, %s609_s12, %s1141_s22, %s1141_s22, %s1142_s17  }
 0x13c PF: > { %s638_s21 = sand.u32 1, %s1114_s9   ;;  %p1375_p8 = scmp.ne.s32.totalorder %s1367_s20, 0 }
 0x13d   : > { %p1376_p12 = scmp.ge.s32.totalorder %s1134_s14, 2  ;;  %s639_s28 = scalar_lea.sflag [#allocation5], %s638_s21 }
 0x13f   : > { %p920_p0 = pnand %p1376_p12, %p1375_p8 }
 0x141   : > { %p921_p2 = pneg %p920_p0 }
 0x143   : > { %1109 = dma.done.wait (%p921_p2), %s639_s28, 1024  }
 0x144   : > { %1111 = vsyncadd (%p921_p2), %s639_s28, 4294966272  ;;  %s19_s14 = sadd.s32 1, %s1134_s14   ;;  %s1377_s9 = smov %s1118_s10 }
 0x145   : > { %p16_p3 = scmp.ge.s32.totalorder %s19_s14, 4   ;;  %s1378_s10 = smov %s1122_s11 }
 0x146   : > { %s1379_s11 = smov %s1257_s15  ;;  %s1380_s12 = smov %s1130_s13 }
 0x147   : > { %s1381_s13 = smov %s1383_s25  ;;  %18 = sbr.rel (!%p16_p3) target bundleno = 7 (0x7), region = 86 }
 0x14c   :  { %644 = vsyncpa [#allocation4], 1 }
 0x14d   :  { %646 = vsyncpa [#allocation4 + $0x1], 1 }
 0x14e   :  { %647 = vsyncpa [#allocation7], 1 }
 0x14f   :  { %648 = vsyncpa [#allocation5], 1 }
 0x150   :  { %650 = vsyncpa [#allocation5 + $0x1], 1 }

</bundles_post_ra>
